<compile_context>
chip_gen: v5e
topology: v5e:2x2
jax: 0.10.0
libtpu: 0.0.40
codegen_flags: <defaults>
</compile_context>

<pallas_src>
import functools

import jax
import jax.numpy as jnp
import numpy as np
from jax.experimental import pallas as pl
from jax.experimental.pallas import tpu as pltpu

LANE = 128        # lane-padded feature width used for every layer
NUM_LAYERS = 6    # enc: 4 linears, dec: 2 linears


def _deepset_kernel(x_ref, w_ref, b_ref, out_ref, *, n_set, inp_dim, pool):
    """x_ref: (b_blk*n_set, inp_dim) bf16, w_ref: (128, 768) bf16,
    b_ref: (1, 768) f32, out_ref: (b_blk, 128) f32."""
    rows = x_ref.shape[0]

    def layer(h, j, k_in, relu, out_dtype):
        # Static ref slices: only the 128x128 (or k_in x 128) tile this layer needs.
        w = w_ref[:k_in, j * LANE:(j + 1) * LANE]            # bf16 (k_in, 128)
        acc = jnp.dot(h.astype(jnp.bfloat16), w,
                      preferred_element_type=jnp.float32)    # MXU, f32 accumulate
        acc = acc + b_ref[:, j * LANE:(j + 1) * LANE]        # f32 bias add (VPU)
        if relu:
            acc = jnp.maximum(acc, 0.0)
        return acc.astype(out_dtype)

    # Encoder: Linear+ReLU x3 (bf16 inter-layer activations).
    h = layer(x_ref[...], 0, inp_dim, True, jnp.bfloat16)
    h = layer(h, 1, LANE, True, jnp.bfloat16)
    h = layer(h, 2, LANE, True, jnp.bfloat16)

    # Note: pooling reshape is tile-aligned (sublane reduce) when n_set % 8 == 0.
    if pool == 'max':
        # Last encoder layer per set element (no ReLU), pool the f32 result.
        h = layer(h, 3, LANE, False, jnp.float32)
        h = h.reshape(rows // n_set, n_set, LANE)
        pooled = jnp.max(h, axis=1)
    else:
        # Hoist pooling above the (linear, no-ReLU) last encoder layer:
        #   mean: pool(h @ W4 + b4) == pool(h) @ W4 + b4
        #   sum : pool(h @ W4 + b4) == pool(h) @ W4 + N * b4
        # -> layer 4 runs on (b_blk, 128) instead of (rows_blk, 128).
        h32 = h.astype(jnp.float32).reshape(rows // n_set, n_set, LANE)
        if pool == 'mean':
            ph = jnp.sum(h32, axis=1) * (1.0 / n_set)        # compile-time reciprocal
            pooled = layer(ph, 3, LANE, False, jnp.float32)
        else:  # 'sum'
            ph = jnp.sum(h32, axis=1)
            w = w_ref[:LANE, 3 * LANE:4 * LANE]
            acc = jnp.dot(ph.astype(jnp.bfloat16), w,
                          preferred_element_type=jnp.float32)
            pooled = acc + float(n_set) * b_ref[:, 3 * LANE:4 * LANE]

    # Decoder: Linear -> ReLU -> Linear.
    d = layer(pooled, 4, LANE, True, jnp.bfloat16)
    d = layer(d, 5, LANE, False, jnp.float32)

    out_ref[...] = d.astype(out_ref.dtype)


def _pack_params(params, inp_dim, h_dim, out_dim):
    """Pack the 6 (W, b) pairs into one lane-padded weight slab and one bias slab."""
    assert inp_dim <= LANE and h_dim <= LANE and out_dim <= LANE, (
        f"feature dims must fit one 128-lane tile, got "
        f"inp_dim={inp_dim}, h_dim={h_dim}, out_dim={out_dim}")
    layout = [('1', inp_dim, h_dim), ('2', h_dim, h_dim), ('3', h_dim, h_dim),
              ('4', h_dim, h_dim), ('d1', h_dim, out_dim), ('d2', out_dim, out_dim)]
    w_cols, b_cols = [], []
    for name, fin, fout in layout:
        w = params['w' + name].astype(jnp.float32)              # (fin, fout)
        b = params['b' + name].reshape(1, fout).astype(jnp.float32)
        w_cols.append(jnp.zeros((LANE, LANE), jnp.float32).at[:fin, :fout].set(w))
        b_cols.append(jnp.zeros((1, LANE), jnp.float32).at[:, :fout].set(b))
    w_slab = jnp.concatenate(w_cols, axis=1).astype(jnp.bfloat16)  # (128, 768) bf16
    b_slab = jnp.concatenate(b_cols, axis=1)                       # (1, 768)  f32
    return w_slab, b_slab


def _pick_batch_block(B, N, target_rows=2048):
    """Batch-block size.  The wrapper pads B up to a multiple of it, so VMEM use
    is always bounded by ~target_rows set-rows per block (no giant fallback block).
    For B >= 16 the block is 8-sublane aligned and the grid has >= 2 steps so
    both v7x TensorCores get work under the 'parallel' grid axis."""
    cap = max(1, target_rows // max(N, 1))
    if B < 16:
        return B                           # tiny batch: a single full-batch block
    b_blk = min(cap, B // 2)               # guarantee >= 2 grid steps
    b_blk = max(8, (b_blk // 8) * 8)       # 8-aligned output / row blocks
    return b_blk


def small_deep_set_forward(x, params, pool='max'):
    """x: (B, N, inp_dim) float32 -> (B, output_dim) float32."""
    if pool not in ('max', 'mean', 'sum'):
        raise ValueError(f"unsupported pool mode: {pool}")
    B, N, inp_dim = x.shape
    h_dim = params['w2'].shape[0]
    out_dim = params['wd2'].shape[-1]
    assert inp_dim <= LANE and h_dim <= LANE and out_dim <= LANE, (
        "SmallDeepSet Pallas kernel assumes all feature dims <= 128")

    w_slab, b_slab = _pack_params(params, inp_dim, h_dim, out_dim)
    x2d = x.reshape(B * N, inp_dim).astype(jnp.bfloat16)   # flatten in the wrapper

    b_blk = _pick_batch_block(B, N)
    n_blocks = -(-B // b_blk)            # ceil
    B_pad = n_blocks * b_blk
    if B_pad != B:
        # Zero-padded batch rows are independent sets; their outputs are sliced off.
        pad = jnp.zeros(((B_pad - B) * N, inp_dim), x2d.dtype)
        x2d = jnp.concatenate([x2d, pad], axis=0)

    rows_blk = b_blk * N
    grid = (n_blocks,)

    kernel = functools.partial(_deepset_kernel, n_set=N, inp_dim=inp_dim, pool=pool)

    out_padded = pl.pallas_call(
        kernel,
        out_shape=jax.ShapeDtypeStruct((B_pad, LANE), jnp.float32),
        grid=grid,
        in_specs=[
            pl.BlockSpec((rows_blk, inp_dim), lambda i: (i, 0)),        # x block
            pl.BlockSpec((LANE, NUM_LAYERS * LANE), lambda i: (0, 0)),  # weight slab (resident)
            pl.BlockSpec((1, NUM_LAYERS * LANE), lambda i: (0, 0)),     # bias slab (resident)
        ],
        out_specs=pl.BlockSpec((b_blk, LANE), lambda i: (i, 0)),
        compiler_params=pltpu.CompilerParams(
            dimension_semantics=("parallel",)),
    )(x2d, w_slab, b_slab)

    return out_padded[:B, :out_dim]


def init_params(key, inp_dim=16, h_dim=64, output_dim=10):
    """Deterministic params matching nn.Linear's default U(-1/sqrt(fan_in), +) init."""
    layer_dims = [
        ('1', inp_dim, h_dim),
        ('2', h_dim, h_dim),
        ('3', h_dim, h_dim),
        ('4', h_dim, h_dim),
        ('d1', h_dim, output_dim),
        ('d2', output_dim, output_dim),
    ]
    params = {}
    keys = jax.random.split(key, 2 * len(layer_dims))
    for i, (name, fin, fout) in enumerate(layer_dims):
        bound = 1.0 / float(fin) ** 0.5
        params['w' + name] = jax.random.uniform(
            keys[2 * i], (fin, fout), jnp.float32, -bound, bound)
        params['b' + name] = jax.random.uniform(
            keys[2 * i + 1], (1, fout), jnp.float32, -bound, bound)
    return params


def _reference_forward(x, params, pool):
    """Pure-JAX reference matching the module's op order, with the same
    bf16-matmul / f32-accumulate precision."""
    def lin(h, w, b):
        return jnp.dot(h.astype(jnp.bfloat16), w.astype(jnp.bfloat16),
                       preferred_element_type=jnp.float32) + b
    B, N, D = x.shape
    h = x.reshape(B * N, D)
    h = jnp.maximum(lin(h, params['w1'], params['b1']), 0.0)
    h = jnp.maximum(lin(h, params['w2'], params['b2']), 0.0)
    h = jnp.maximum(lin(h, params['w3'], params['b3']), 0.0)
    h = lin(h, params['w4'], params['b4'])
    h = h.reshape(B, N, -1)
    if pool == 'max':
        p = jnp.max(h, axis=1)
    elif pool == 'mean':
        p = jnp.mean(h, axis=1)
    else:
        p = jnp.sum(h, axis=1)
    d = jnp.maximum(lin(p, params['wd1'], params['bd1']), 0.0)
    return lin(d, params['wd2'], params['bd2'])


if __name__ == "__main__":
    key = jax.random.PRNGKey(0)
    pkey, xkey = jax.random.split(key)

    # Small shapes consistent with the module: batch=2, set size=8, inp_dim=16.
    B, N, INP, H, OUT = 2, 8, 16, 64, 10
    params = init_params(pkey, inp_dim=INP, h_dim=H, output_dim=OUT)
    x = jax.random.normal(xkey, (B, N, INP), jnp.float32)

    for pool in ('max', 'mean', 'sum'):
        out = jax.block_until_ready(small_deep_set_forward(x, params, pool=pool))
        assert out.shape == (B, OUT), out.shape
        ref = jax.block_until_ready(_reference_forward(x, params, pool))
        np.testing.assert_allclose(np.asarray(out), np.asarray(ref),
                                   rtol=5e-3, atol=5e-3)

    print("KERNEL_OK")
</pallas_src>

<mosaic_0001>
module attributes {stable_mosaic.version = 11 : i64} {
  func.func @_deepset_kernel(%arg0: i32, %arg1: memref<16x16xbf16, #tpu.memory_space<vmem>>, %arg2: memref<128x768xbf16, #tpu.memory_space<vmem>>, %arg3: memref<1x768xf32, #tpu.memory_space<vmem>>, %arg4: memref<2x128xf32, #tpu.memory_space<vmem>>) attributes {dimension_semantics = [#tpu.dimension_semantics<parallel>], iteration_bounds = array<i64: 1>, scalar_prefetch = 0 : i64, scratch_operands = 0 : i64, tpu.core_type = #tpu.core_type<tc>, window_params = [{transform_indices = @transform_0, window_bounds = array<i64: 16, 16>}, {pipeline_mode = #tpu.pipeline_mode<synchronous>, transform_indices = @transform_1, window_bounds = array<i64: 128, 768>}, {pipeline_mode = #tpu.pipeline_mode<synchronous>, transform_indices = @transform_2, window_bounds = array<i64: 1, 768>}, {transform_indices = @transform_3, window_bounds = array<i64: 2, 128>}]} {
    %c0 = arith.constant 0 : index
    %c0_0 = arith.constant 0 : index
    %0 = vector.load %arg1[%c0, %c0_0] : memref<16x16xbf16, #tpu.memory_space<vmem>>, vector<16x16xbf16>
    %c0_1 = arith.constant 0 : index
    %c0_2 = arith.constant 0 : index
    %1 = vector.load %arg2[%c0_1, %c0_2] : memref<128x768xbf16, #tpu.memory_space<vmem>>, vector<16x128xbf16>
    %cst = arith.constant dense<0.000000e+00> : vector<16x128xf32>
    %2 = tpu.matmul %0, %1, %cst {dimension_numbers = #tpu.dot_dimension_numbers<[1], [0], [0], [1], [0, 0, 1, 1], [], []>} : vector<16x16xbf16>, vector<16x128xbf16>, vector<16x128xf32> -> vector<16x128xf32>
    %c0_3 = arith.constant 0 : index
    %c0_4 = arith.constant 0 : index
    %3 = vector.load %arg3[%c0_3, %c0_4] : memref<1x768xf32, #tpu.memory_space<vmem>>, vector<1x128xf32>
    %4 = vector.broadcast %3 : vector<1x128xf32> to vector<16x128xf32>
    %5 = arith.addf %2, %4 : vector<16x128xf32>
    %cst_5 = arith.constant 0.000000e+00 : f32
    %6 = vector.broadcast %cst_5 : f32 to vector<16x128xf32>
    %7 = arith.maximumf %5, %6 : vector<16x128xf32>
    %8 = arith.truncf %7 : vector<16x128xf32> to vector<16x128xbf16>
    %c0_6 = arith.constant 0 : index
    %c128 = arith.constant 128 : index
    %9 = vector.load %arg2[%c0_6, %c128] : memref<128x768xbf16, #tpu.memory_space<vmem>>, vector<128x128xbf16>
    %cst_7 = arith.constant dense<0.000000e+00> : vector<16x128xf32>
    %10 = tpu.matmul %8, %9, %cst_7 {dimension_numbers = #tpu.dot_dimension_numbers<[1], [0], [0], [1], [0, 0, 1, 1], [], []>} : vector<16x128xbf16>, vector<128x128xbf16>, vector<16x128xf32> -> vector<16x128xf32>
    %c0_8 = arith.constant 0 : index
    %c128_9 = arith.constant 128 : index
    %11 = vector.load %arg3[%c0_8, %c128_9] : memref<1x768xf32, #tpu.memory_space<vmem>>, vector<1x128xf32>
    %12 = vector.broadcast %11 : vector<1x128xf32> to vector<16x128xf32>
    %13 = arith.addf %10, %12 : vector<16x128xf32>
    %cst_10 = arith.constant 0.000000e+00 : f32
    %14 = vector.broadcast %cst_10 : f32 to vector<16x128xf32>
    %15 = arith.maximumf %13, %14 : vector<16x128xf32>
    %16 = arith.truncf %15 : vector<16x128xf32> to vector<16x128xbf16>
    %c0_11 = arith.constant 0 : index
    %c256 = arith.constant 256 : index
    %17 = vector.load %arg2[%c0_11, %c256] : memref<128x768xbf16, #tpu.memory_space<vmem>>, vector<128x128xbf16>
    %cst_12 = arith.constant dense<0.000000e+00> : vector<16x128xf32>
    %18 = tpu.matmul %16, %17, %cst_12 {dimension_numbers = #tpu.dot_dimension_numbers<[1], [0], [0], [1], [0, 0, 1, 1], [], []>} : vector<16x128xbf16>, vector<128x128xbf16>, vector<16x128xf32> -> vector<16x128xf32>
    %c0_13 = arith.constant 0 : index
    %c256_14 = arith.constant 256 : index
    %19 = vector.load %arg3[%c0_13, %c256_14] : memref<1x768xf32, #tpu.memory_space<vmem>>, vector<1x128xf32>
    %20 = vector.broadcast %19 : vector<1x128xf32> to vector<16x128xf32>
    %21 = arith.addf %18, %20 : vector<16x128xf32>
    %cst_15 = arith.constant 0.000000e+00 : f32
    %22 = vector.broadcast %cst_15 : f32 to vector<16x128xf32>
    %23 = arith.maximumf %21, %22 : vector<16x128xf32>
    %24 = arith.truncf %23 : vector<16x128xf32> to vector<16x128xbf16>
    %c0_16 = arith.constant 0 : index
    %c384 = arith.constant 384 : index
    %25 = vector.load %arg2[%c0_16, %c384] : memref<128x768xbf16, #tpu.memory_space<vmem>>, vector<128x128xbf16>
    %cst_17 = arith.constant dense<0.000000e+00> : vector<16x128xf32>
    %26 = tpu.matmul %24, %25, %cst_17 {dimension_numbers = #tpu.dot_dimension_numbers<[1], [0], [0], [1], [0, 0, 1, 1], [], []>} : vector<16x128xbf16>, vector<128x128xbf16>, vector<16x128xf32> -> vector<16x128xf32>
    %c0_18 = arith.constant 0 : index
    %c384_19 = arith.constant 384 : index
    %27 = vector.load %arg3[%c0_18, %c384_19] : memref<1x768xf32, #tpu.memory_space<vmem>>, vector<1x128xf32>
    %28 = vector.broadcast %27 : vector<1x128xf32> to vector<16x128xf32>
    %29 = arith.addf %26, %28 : vector<16x128xf32>
    %30 = vector.shape_cast %29 : vector<16x128xf32> to vector<2x8x128xf32>
    %cst_20 = arith.constant dense<0xFF800000> : vector<2x128xf32>
    %31 = vector.multi_reduction <maximumf>, %30, %cst_20 [1] : vector<2x8x128xf32> to vector<2x128xf32>
    %c0_21 = arith.constant 0 : index
    %c512 = arith.constant 512 : index
    %32 = vector.load %arg2[%c0_21, %c512] : memref<128x768xbf16, #tpu.memory_space<vmem>>, vector<128x128xbf16>
    %33 = arith.truncf %31 : vector<2x128xf32> to vector<2x128xbf16>
    %cst_22 = arith.constant dense<0.000000e+00> : vector<2x128xf32>
    %34 = tpu.matmul %33, %32, %cst_22 {dimension_numbers = #tpu.dot_dimension_numbers<[1], [0], [0], [1], [0, 0, 1, 1], [], []>} : vector<2x128xbf16>, vector<128x128xbf16>, vector<2x128xf32> -> vector<2x128xf32>
    %c0_23 = arith.constant 0 : index
    %c512_24 = arith.constant 512 : index
    %35 = vector.load %arg3[%c0_23, %c512_24] : memref<1x768xf32, #tpu.memory_space<vmem>>, vector<1x128xf32>
    %36 = vector.broadcast %35 : vector<1x128xf32> to vector<2x128xf32>
    %37 = arith.addf %34, %36 : vector<2x128xf32>
    %cst_25 = arith.constant 0.000000e+00 : f32
    %38 = vector.broadcast %cst_25 : f32 to vector<2x128xf32>
    %39 = arith.maximumf %37, %38 : vector<2x128xf32>
    %40 = arith.truncf %39 : vector<2x128xf32> to vector<2x128xbf16>
    %c0_26 = arith.constant 0 : index
    %c640 = arith.constant 640 : index
    %41 = vector.load %arg2[%c0_26, %c640] : memref<128x768xbf16, #tpu.memory_space<vmem>>, vector<128x128xbf16>
    %cst_27 = arith.constant dense<0.000000e+00> : vector<2x128xf32>
    %42 = tpu.matmul %40, %41, %cst_27 {dimension_numbers = #tpu.dot_dimension_numbers<[1], [0], [0], [1], [0, 0, 1, 1], [], []>} : vector<2x128xbf16>, vector<128x128xbf16>, vector<2x128xf32> -> vector<2x128xf32>
    %c0_28 = arith.constant 0 : index
    %c640_29 = arith.constant 640 : index
    %43 = vector.load %arg3[%c0_28, %c640_29] : memref<1x768xf32, #tpu.memory_space<vmem>>, vector<1x128xf32>
    %44 = vector.broadcast %43 : vector<1x128xf32> to vector<2x128xf32>
    %45 = arith.addf %42, %44 : vector<2x128xf32>
    %c0_30 = arith.constant 0 : index
    %c0_31 = arith.constant 0 : index
    %46 = vector.load %arg4[%c0_30, %c0_31] : memref<2x128xf32, #tpu.memory_space<vmem>>, vector<2x128xf32>
    tpu.vector_store %arg4[%c0_30, %c0_31], %45 {strides = array<i32>} : memref<2x128xf32, #tpu.memory_space<vmem>>, vector<2x128xf32>,
    return
  }
  func.func @transform_0(%arg0: i32) -> (i32, i32) {
    %c0_i32 = arith.constant 0 : i32
    %c0_i32_0 = arith.constant 0 : i32
    return %arg0, %c0_i32 : i32, i32
  }
  func.func @transform_1(%arg0: i32) -> (i32, i32) {
    %c0_i32 = arith.constant 0 : i32
    %c0_i32_0 = arith.constant 0 : i32
    %c0_i32_1 = arith.constant 0 : i32
    return %c0_i32, %c0_i32_0 : i32, i32
  }
  func.func @transform_2(%arg0: i32) -> (i32, i32) {
    %c0_i32 = arith.constant 0 : i32
    %c0_i32_0 = arith.constant 0 : i32
    %c0_i32_1 = arith.constant 0 : i32
    return %c0_i32, %c0_i32_0 : i32, i32
  }
  func.func @transform_3(%arg0: i32) -> (i32, i32) {
    %c0_i32 = arith.constant 0 : i32
    %c0_i32_0 = arith.constant 0 : i32
    return %arg0, %c0_i32 : i32, i32
  }
}

</mosaic_0001>

<bundles_post_ra>
// kernel: tpu_custom_call.1
= control target key start
LH: loop header
LB: loop body
LE: loop exit
PB: predicated region body
PF: predicated region fallthrough
CT: control target
= control target key end

     0   :  { %8 = vsyncpa [#allocation3], 0  ;;  %s925_s0 = inlined_call_operand.hbm [shape: bf16[16,16], index: 0, kind: input, shape index: {}]   ;;  %s926_s1 = inlined_call_operand.hbm [shape: bf16[128,768], index: 1, kind: input, shape index: {}]   ;;  %s927_s2 = inlined_call_operand.hbm [shape: f32[1,768], index: 2, kind: input, shape index: {}]   ;;  %s928_s3 = inlined_call_operand.hbm [shape: f32[2,128], index: 3, kind: output, shape index: {}]  }
   0x1   :  { %9 = vsyncpa [#allocation6], 0  ;;  %s28_s14 = sshll.u32 %s926_s1, 4  ;;  %s29_s14 = int_to_ptr.hbm [resolvable:$true] %s28_s14 }
   0x2   :  { %10 = vsyncpa [#allocation4], 0  ;;  %s885_s15 = smov [#allocation5]   ;;  %s15_s19 = sshll.u32 %s925_s0, 4  ;;  %s16_s19 = int_to_ptr.hbm [resolvable:$true] %s15_s19 }
   0x3   :  { %s30_s16 = sshll.u32 %s885_s15, 4  ;;  %s886_s20 = smov 384   ;;  %s31_s16 = int_to_ptr.vmem [resolvable:$true] %s30_s16 }
   0x4   :  { %s887_s21 = smov 24   ;;  %s888_s22 = smov [#allocation2]  }
   0x5   :  { %36 = dma.hbm_to_vmem [thread:$0]  %s29_s14, 6144, %s31_s16, [#allocation6], %s886_s20, %s886_s20, %s887_s21  }
   0x6   :  { %s17_s23 = sshll.u32 %s888_s22, 4  ;;  %s889_s24 = smov 64   ;;  %s18_s23 = int_to_ptr.vmem [resolvable:$true] %s17_s23 }
   0x7   :  { %s890_s25 = smov 4   ;;  %s42_s27 = sshll.u32 %s927_s2, 4  ;;  %s43_s27 = int_to_ptr.hbm [resolvable:$true] %s42_s27 }
   0x8   :  { %23 = dma.hbm_to_vmem [thread:$0]  %s16_s19, 128, %s18_s23, [#allocation3], %s889_s24, %s889_s24, %s890_s25  }
   0x9   :  { %s891_s28 = smov [#allocation7]  }
   0xa   :  { %s44_s29 = sshll.u32 %s891_s28, 4  ;;  %s45_s29 = int_to_ptr.vmem [resolvable:$true] %s44_s29 }
   0xb   :  { %47 = dma.hbm_to_vmem [thread:$0]  %s43_s27, 96, %s45_s29, [#allocation6]  }
   0xc   :  { %879 = dma.done.wait [#allocation3], 128  }
   0xd   :  { %880 = vsyncadd [#allocation3], 4294967168 }
   0xe   :  { %881 = dma.done.wait [#allocation6], 6240  }
   0xf   :  { %882 = vsyncadd [#allocation6], 4294961056  ;;  %v564_v0 = vld [vmem:[#allocation5] sm:$0xf]  ;;  %v728_v1 = vld [vmem:[#allocation5 + $0x14] sm:$0xf0] }
  0x10   :  { %v565_v2 = vor.u32 %v728_v1, %v564_v0  ;;  %v597_v3 = vld [vmem:[#allocation5 + $0x154] sm:$0xf]  ;;  %v736_v4 = vld [vmem:[#allocation5 + $0x168] sm:$0xf0]  ;;  %v593_v5 = vld [vmem:[#allocation5 + $0x124] sm:$0xf] }
  0x11   :  { %v727_v6 = vld [vmem:[#allocation2] sm:$0xff]  ;;  %v598_v7 = vor.u32 %v736_v4, %v597_v3  ;;  %vm80_vm0 = vcmask 130048   ;;  %v589_v9 = vld [vmem:[#allocation5 + $0xf4] sm:$0xf]  ;;  %v734_v11 = vld [vmem:[#allocation5 + $0x108] sm:$0xf0] }
  0x12   :  { %v735_v8 = vld [vmem:[#allocation5 + $0x138] sm:$0xf0]  ;;  %91 = vmatpush.bf16.msra.mxu0 %v565_v2  ;;  %v590_v12 = vor.u32 %v734_v11, %v589_v9  ;;  %v585_v13 = vld [vmem:[#allocation5 + $0xc4] sm:$0xf]  ;;  %v581_v16 = vld [vmem:[#allocation5 + $0x94] sm:$0xf] }
  0x13   :  { %169 = vmatpush.bf16.msra.mxu1 %v598_v7  ;;  %v594_v10 = vor.u32 %v735_v8, %v593_v5  ;;  %v733_v14 = vld [vmem:[#allocation5 + $0xd8] sm:$0xf0]  ;;  %v732_v17 = vld [vmem:[#allocation5 + $0xa8] sm:$0xf0]  ;;  %v577_v19 = vld [vmem:[#allocation5 + $0x64] sm:$0xf] }
  0x14   :  { %v586_v15 = vor.u32 %v733_v14, %v585_v13  ;;  %v582_v18 = vor.u32 %v732_v17, %v581_v16  ;;  %v731_v20 = vld [vmem:[#allocation5 + $0x78] sm:$0xf0]  ;;  %v573_v22 = vld [vmem:[#allocation5 + $0x34] sm:$0xf]  ;;  %v730_v23 = vld [vmem:[#allocation5 + $0x48] sm:$0xf0] }
  0x15   :  { %566 = vmatmul.msk.bf16.vlgmr.msra.gmra.mxu0 %vm80_vm0, %v727_v6  ;;  %v578_v21 = vor.u32 %v731_v20, %v577_v19  ;;  %v574_v24 = vor.u32 %v730_v23, %v573_v22  ;;  %v569_v25 = vld [vmem:[#allocation5 + $0x4] sm:$0xf]  ;;  %v729_v26 = vld [vmem:[#allocation5 + $0x18] sm:$0xf0]  ;;  %v629_v28 = vld [vmem:[#allocation5 + $0x158] sm:$0xf] }
  0x16   :  { %v570_v27 = vor.u32 %v729_v26, %v569_v25  ;;  %v744_v29 = vld [vmem:[#allocation5 + $0x16c] sm:$0xf0]  ;;  %v625_v30 = vld [vmem:[#allocation5 + $0x128] sm:$0xf]  ;;  %v743_v32 = vld [vmem:[#allocation5 + $0x13c] sm:$0xf0] }
  0x17   :  { %170 = vmatpush.bf16.msra.mxu1 %v594_v10  ;;  %v630_v31 = vor.u32 %v744_v29, %v629_v28  ;;  %v626_v33 = vor.u32 %v743_v32, %v625_v30  ;;  %v621_v34 = vld [vmem:[#allocation5 + $0xf8] sm:$0xf]  ;;  %v742_v35 = vld [vmem:[#allocation5 + $0x10c] sm:$0xf0]  ;;  %v617_v37 = vld [vmem:[#allocation5 + $0xc8] sm:$0xf] }
  0x18   :  { %v622_v36 = vor.u32 %v742_v35, %v621_v34  ;;  %v741_v38 = vld [vmem:[#allocation5 + $0xdc] sm:$0xf0]  ;;  %v613_v48 = vld [vmem:[#allocation5 + $0x98] sm:$0xf]  ;;  %v740_v49 = vld [vmem:[#allocation5 + $0xac] sm:$0xf0] }
  0x19   :  { %254 = vmatpush.bf16.msra.mxu2 %v630_v31  ;;  %v618_v39 = vor.u32 %v741_v38, %v617_v37  ;;  %v777_v41 = vld [vmem:[#allocation7] ss:$0 sm:$0xff]  ;;  %v614_v50 = vor.u32 %v740_v49, %v613_v48  ;;  %v609_v51 = vld [vmem:[#allocation5 + $0x68] sm:$0xf]  ;;  %v605_v54 = vld [vmem:[#allocation5 + $0x38] sm:$0xf] }
  0x1a   :  { %v739_v52 = vld [vmem:[#allocation5 + $0x7c] sm:$0xf0]  ;;  %v738_v55 = vld [vmem:[#allocation5 + $0x4c] sm:$0xf0]  ;;  %v601_v57 = vld [vmem:[#allocation5 + $0x8] sm:$0xf] }
  0x1b   :  { %171 = vmatpush.bf16.msra.mxu1 %v590_v12  ;;  %v610_v53 = vor.u32 %v739_v52, %v609_v51  ;;  %v606_v56 = vor.u32 %v738_v55, %v605_v54  ;;  %v737_v58 = vld [vmem:[#allocation5 + $0x1c] sm:$0xf0]  ;;  %v661_v60 = vld [vmem:[#allocation5 + $0x15c] sm:$0xf]  ;;  %v752_v61 = vld [vmem:[#allocation5 + $0x170] sm:$0xf0] }
  0x1c   :  { %v602_v59 = vor.u32 %v737_v58, %v601_v57  ;;  %v657_v62 = vld [vmem:[#allocation5 + $0x12c] sm:$0xf]  ;;  %v662_v63 = vor.u32 %v752_v61, %v661_v60  ;;  %v751_v0 = vld [vmem:[#allocation5 + $0x140] sm:$0xf0]  ;;  %v653_v2 = vld [vmem:[#allocation5 + $0xfc] sm:$0xf] }
  0x1d   :  { %255 = vmatpush.bf16.msra.mxu2 %v626_v33  ;;  %v658_v1 = vor.u32 %v751_v0, %v657_v62  ;;  %v750_v3 = vld [vmem:[#allocation5 + $0x110] sm:$0xf0]  ;;  %v649_v5 = vld [vmem:[#allocation5 + $0xcc] sm:$0xf]  ;;  %v749_v6 = vld [vmem:[#allocation5 + $0xe0] sm:$0xf0] }
  0x1e   :  { %339 = vmatpush.bf16.msra.mxu3 %v662_v63  ;;  %v654_v4 = vor.u32 %v750_v3, %v653_v2  ;;  %v650_v7 = vor.u32 %v749_v6, %v649_v5  ;;  %v778_v9 = vld [vmem:[#allocation7 + $0x1] ss:$0 sm:$0xff]  ;;  %v645_v16 = vld [vmem:[#allocation5 + $0x9c] sm:$0xf]  ;;  %v748_v17 = vld [vmem:[#allocation5 + $0xb0] sm:$0xf0] }
  0x1f   :  { %172 = vmatpush.bf16.msra.mxu1 %v586_v15  ;;  %v641_v19 = vld [vmem:[#allocation5 + $0x6c] sm:$0xf]  ;;  %v747_v20 = vld [vmem:[#allocation5 + $0x80] sm:$0xf0]  ;;  %v637_v22 = vld [vmem:[#allocation5 + $0x3c] sm:$0xf] }
  0x20   :  { %v746_v23 = vld [vmem:[#allocation5 + $0x50] sm:$0xf0]  ;;  %v633_v25 = vld [vmem:[#allocation5 + $0xc] sm:$0xf]  ;;  %v745_v26 = vld [vmem:[#allocation5 + $0x20] sm:$0xf0] }
  0x21   :  { %256 = vmatpush.bf16.msra.mxu2 %v622_v36  ;;  %v693_v28 = vld [vmem:[#allocation5 + $0x160] sm:$0xf]  ;;  %v760_v29 = vld [vmem:[#allocation5 + $0x174] sm:$0xf0]  ;;  %v673_v51 = vld [vmem:[#allocation5 + $0x70] sm:$0xf] }
  0x22   :  { %340 = vmatpush.bf16.msra.mxu3 %v658_v1  ;;  %v694_v30 = vor.u32 %v760_v29, %v693_v28  ;;  %v779_v32 = vld [vmem:[#allocation7 + $0x2] ss:$0 sm:$0xff]  ;;  %v756_v49 = vld [vmem:[#allocation5 + $0xb4] sm:$0xf0]  ;;  %v755_v52 = vld [vmem:[#allocation5 + $0x84] sm:$0xf0] }
  0x23   :  { %173 = vmatpush.bf16.msra.mxu1 %v582_v18  ;;  %v646_v18 = vor.u32 %v748_v17, %v645_v16  ;;  %v677_v48 = vld [vmem:[#allocation5 + $0xa0] sm:$0xf]  ;;  %v754_v55 = vld [vmem:[#allocation5 + $0x54] sm:$0xf0]  ;;  %v665_v57 = vld [vmem:[#allocation5 + $0x10] sm:$0xf] }
  0x24   :  { %443 = vmatpush.bf16.msrb.mxu0 %v694_v30  ;;  %v669_v54 = vld [vmem:[#allocation5 + $0x40] sm:$0xf]  ;;  %v753_v58 = vld [vmem:[#allocation5 + $0x24] sm:$0xf0]  ;;  %v725_v61 = vld [vmem:[#allocation5 + $0x164] sm:$0xf] }
  0x25   :  { %257 = vmatpush.bf16.msra.mxu2 %v618_v39  ;;  %v689_v39 = vld [vmem:[#allocation5 + $0x130] sm:$0xf]  ;;  %v780_v60 = vld [vmem:[#allocation7 + $0x3] ss:$0 sm:$0xff]  ;;  %v768_v62 = vld [vmem:[#allocation5 + $0x178] sm:$0xf0] }
  0x26   :  { %341 = vmatpush.bf16.msra.mxu3 %v654_v4  ;;  %v721_v63 = vld [vmem:[#allocation5 + $0x134] sm:$0xf]  ;;  %v726_v0 = vor.u32 %v768_v62, %v725_v61  ;;  %v767_v1 = vld [vmem:[#allocation5 + $0x148] sm:$0xf0]  ;;  %v717_v5 = vld [vmem:[#allocation5 + $0x104] sm:$0xf] }
  0x27   :  { %174 = vmatpush.bf16.msra.mxu1 %v578_v21  ;;  %v642_v21 = vor.u32 %v747_v20, %v641_v19  ;;  %v722_v4 = vor.u32 %v767_v1, %v721_v63  ;;  %v766_v6 = vld [vmem:[#allocation5 + $0x118] sm:$0xf0]  ;;  %v709_v17 = vld [vmem:[#allocation5 + $0xa4] sm:$0xf]  ;;  %vm391_vm1 = vcmask 1041409   ;;  %s892_s0 = smov [#allocation8]  }
  0x28   :  { %s545_s2 = sshll.u32 %s892_s0, 4  ;;  %s547_s5 = sshll.u32 %s928_s3, 4  ;;  %s546_s2 = int_to_ptr.vmem [resolvable:$true] %s545_s2  ;;  %s548_s5 = int_to_ptr.hbm [resolvable:$true] %s547_s5 }
  0x29   :  { %258 = vmatpush.bf16.msra.mxu2 %v614_v50  ;;  %v678_v50 = vor.u32 %v756_v49, %v677_v48  ;;  %v782_v49 = vld [vmem:[#allocation7 + $0x5] ss:$0 sm:$0xff] }
  0x2a   :  { %342 = vmatpush.bf16.msra.mxu3 %v650_v7 }
  0x2b   :  { %175 = vmatpush.bf16.msra.mxu1 %v574_v24  ;;  %v638_v24 = vor.u32 %v746_v23, %v637_v22  ;;  %v705_v23 = vld [vmem:[#allocation5 + $0x74] sm:$0xf] }
  0x2d   :  { %259 = vmatpush.bf16.msra.mxu2 %v610_v53  ;;  %v674_v53 = vor.u32 %v755_v52, %v673_v51 }
  0x2e   :  { %343 = vmatpush.bf16.msra.mxu3 %v646_v18  ;;  %v764_v18 = vld [vmem:[#allocation5 + $0xb8] sm:$0xf0] }
  0x2f   :  { %176 = vmatpush.bf16.msra.mxu1 %v570_v27  ;;  %v634_v27 = vor.u32 %v745_v26, %v633_v25  ;;  %v710_v22 = vor.u32 %v764_v18, %v709_v17 }
  0x31   :  { %260 = vmatpush.bf16.msra.mxu2 %v606_v56  ;;  %v670_v56 = vor.u32 %v754_v55, %v669_v54 }
  0x32   :  { %344 = vmatpush.bf16.msra.mxu3 %v642_v21 }
  0x33   :  { %526 = vmatpush.bf16.msrb.mxu1 %v726_v0 }
  0x35   :  { %261 = vmatpush.bf16.msra.mxu2 %v602_v59  ;;  %v666_v59 = vor.u32 %v753_v58, %v665_v57 }
  0x36   :  { %345 = vmatpush.bf16.msra.mxu3 %v638_v24  ;;  %v763_v24 = vld [vmem:[#allocation5 + $0x88] sm:$0xf0] }
  0x37   :  { %527 = vmatpush.bf16.msrb.mxu1 %v722_v4  ;;  %v706_v28 = vor.u32 %v763_v24, %v705_v23 }
  0x3a   :  { %346 = vmatpush.bf16.msra.mxu3 %v634_v27 }
  0x92   :  { %v93_v40 = vpop.f32.mrf.mxu0 }
  0x93   :  { %v94_v42 = vadd.f32 %v777_v41, %v93_v40  ;;  %v759_v40 = vld [vmem:[#allocation5 + $0x144] sm:$0xf0] }
  0x95   :  { %v98_v45 = vmax.f32 %v94_v42, 0.0  ;;  %v685_v42 = vld [vmem:[#allocation5 + $0x100] sm:$0xf] }
  0x9a   :  { %v95_v43 = vpop.f32.mrf.mxu0 }
  0x9b   :  { %v96_v44 = vadd.f32 %v777_v41, %v95_v43  ;;  %v690_v41 = vor.u32 %v759_v40, %v689_v39  ;;  %v758_v43 = vld [vmem:[#allocation5 + $0x114] sm:$0xf0]  ;;  %v697_v40 = vld [vmem:[#allocation5 + $0x14] sm:$0xf] }
  0x9d   :  { %v99_v46 = vmax.f32 %v96_v44, 0.0  ;;  %444 = vmatpush.bf16.msrb.mxu0 %v690_v41  ;;  %v686_v44 = vor.u32 %v758_v43, %v685_v42  ;;  %v761_v41 = vld [vmem:[#allocation5 + $0x28] sm:$0xf0]  ;;  %v781_v43 = vld [vmem:[#allocation7 + $0x4] ss:$0 sm:$0xff] }
  0x9e   :  { %v698_v42 = vor.u32 %v761_v41, %v697_v40 }
  0x9f   :  { %v100_v47 = vpack.c.bf16 %v99_v46, %v98_v45  ;;  %v681_v45 = vld [vmem:[#allocation5 + $0xd0] sm:$0xf]  ;;  %v757_v46 = vld [vmem:[#allocation5 + $0xe4] sm:$0xf0] }
  0xa1   :  { %177 = vmatmul.bf16.vlgmr.msra.gmra.mxu1 %v100_v47  ;;  %445 = vmatpush.bf16.msrb.mxu0 %v686_v44  ;;  %v682_v47 = vor.u32 %v757_v46, %v681_v45 }
  0xa5   :  { %446 = vmatpush.bf16.msrb.mxu0 %v682_v47 }
  0xa9   :  { %447 = vmatpush.bf16.msrb.mxu0 %v678_v50 }
  0xad   :  { %448 = vmatpush.bf16.msrb.mxu0 %v674_v53 }
  0xb1   :  { %449 = vmatpush.bf16.msrb.mxu0 %v670_v56 }
  0xb5   :  { %450 = vmatpush.bf16.msrb.mxu0 %v666_v59 }
 0x11e   :  { %v178_v8 = vpop.f32.mrf.mxu1 }
 0x11f   :  { %v179_v10 = vadd.f32 %v778_v9, %v178_v8 }
 0x121   :  { %v183_v13 = vmax.f32 %v179_v10, 0.0  ;;  %v713_v10 = vld [vmem:[#allocation5 + $0xd4] sm:$0xf] }
 0x126   :  { %v180_v11 = vpop.f32.mrf.mxu1 }
 0x127   :  { %v181_v12 = vadd.f32 %v778_v9, %v180_v11  ;;  %v718_v9 = vor.u32 %v766_v6, %v717_v5  ;;  %v765_v11 = vld [vmem:[#allocation5 + $0xe8] sm:$0xf0] }
 0x128   :  { %v714_v16 = vor.u32 %v765_v11, %v713_v10 }
 0x129   :  { %v184_v14 = vmax.f32 %v181_v12, 0.0  ;;  %528 = vmatpush.bf16.msrb.mxu1 %v718_v9 }
 0x12b   :  { %v185_v15 = vpack.c.bf16 %v184_v14, %v183_v13 }
 0x12d   :  { %262 = vmatmul.bf16.vlgmr.msra.gmra.mxu2 %v185_v15  ;;  %529 = vmatpush.bf16.msrb.mxu1 %v714_v16 }
 0x131   :  { %530 = vmatpush.bf16.msrb.mxu1 %v710_v22 }
 0x135   :  { %531 = vmatpush.bf16.msrb.mxu1 %v706_v28 }
 0x1b0   :  { %v263_v31 = vpop.f32.mrf.mxu2 }
 0x1b1   :  { %v264_v33 = vadd.f32 %v779_v32, %v263_v31 }
 0x1b3   :  { %v268_v36 = vmax.f32 %v264_v33, 0.0 }
 0x1b8   :  { %v265_v34 = vpop.f32.mrf.mxu2 }
 0x1b9   :  { %v266_v35 = vadd.f32 %v779_v32, %v265_v34 }
 0x1bb   :  { %v269_v37 = vmax.f32 %v266_v35, 0.0 }
 0x1bd   :  { %v270_v38 = vpack.c.bf16 %v269_v37, %v268_v36  ;;  %v701_v37 = vld [vmem:[#allocation5 + $0x44] sm:$0xf] }
 0x1bf   :  { %347 = vmatmul.bf16.vlgmr.msra.gmra.mxu3 %v270_v38  ;;  %v762_v38 = vld [vmem:[#allocation5 + $0x58] sm:$0xf0] }
 0x1c0   :  { %v702_v39 = vor.u32 %v762_v38, %v701_v37 }
 0x1c2   :  { %532 = vmatpush.bf16.msrb.mxu1 %v702_v39 }
 0x1c6   :  { %533 = vmatpush.bf16.msrb.mxu1 %v698_v42 }
 0x242   :  { %v348_v2 = vpop.f32.mrf.mxu3 }
 0x243   :  { %v349_v3 = vadd.f32 %v780_v60, %v348_v2 }
 0x245   :  { %v353_v7 = vrot.slane %v349_v3, 4 }
 0x247   :  { %v354_v8 = vmax.f32 %v349_v3, %v353_v7 }
 0x249   :  { %v355_v12 = vrot.slane %v354_v8, 2 }
 0x24a   :  { %v350_v13 = vpop.f32.mrf.mxu3 }
 0x24b   :  { %v356_v14 = vmax.f32 %v354_v8, %v355_v12  ;;  %v351_v15 = vadd.f32 %v780_v60, %v350_v13 }
 0x24d   :  { %v359_v19 = vrot.slane %v351_v15, 4  ;;  %v357_v20 = vrot.slane %v356_v14, 1 }
 0x24f   :  { %v360_v21 = vmax.f32 %v351_v15, %v359_v19  ;;  %v358_v26 = vmax.f32 %v356_v14, %v357_v20 }
 0x251   :  { %v361_v25 = vrot.slane %v360_v21, 2  ;;  %v381_v30 = vpack.c.bf16 %v358_v26, %v358_v26 }
 0x253   :  { %v362_v27 = vmax.f32 %v360_v21, %v361_v25  ;;  %v389_v33 = vunpack.c.l.b16 %v381_v30 }
 0x255   :  { %v363_v29 = vrot.slane %v362_v27, 1 }
 0x257   :  { %v364_v31 = vmax.f32 %v362_v27, %v363_v29 }
 0x259   :  { %v382_v32 = vpack.c.bf16 %v364_v31, %v364_v31 }
 0x25b   :  { %v390_v34 = vunpack.c.l.b16 %v382_v32 }
 0x25d   :  { %v392_v35 = vsel %vm391_vm1, %v390_v34, %v389_v33 }
 0x25e   :  { %v393_v36 = vpack.c.b16 %v392_v35, %v392_v35 }
 0x260   :  { %451 = vmatmul.bf16.vlgmr.msrb.gmra.mxu0 %v393_v36 }
 0x2dd   :  { %v452_v44 = vpop.f32.mrf.mxu0 }
 0x2de   :  { %v453_v45 = vadd.f32 %v781_v43, %v452_v44 }
 0x2e0   :  { %v456_v46 = vmax.f32 %v453_v45, 0.0 }
 0x2e2   :  { %v457_v47 = vpack.c.bf16 %v456_v46, %v456_v46 }
 0x2e4   :  { %534 = vmatmul.bf16.vlgmr.msrb.gmra.mxu1 %v457_v47 }
 0x2e5   :  { %v454_v48 = vpop.f32.mrf.mxu0 }
 0x361   :  { %v535_v50 = vpop.f32.mrf.mxu1 }
 0x362   :  { %v536_v51 = vadd.f32 %v782_v49, %v535_v50 }
 0x364   :  { %539 = vst [vmem:[#allocation8] sm:$0x3] %v536_v51 }
 0x365   :  { %550 = dma.vmem_to_hbm [thread:$0]  %s546_s2, 32, %s548_s5, [#allocation4]  }
 0x369   :  { %v537_v52 = vpop.f32.mrf.mxu1 }
 0x36a   :  { %883 = dma.done.wait [#allocation4], 32  }
 0x36b   :  { %884 = vsyncadd [#allocation4], 4294967264 }
 0x36c   :  { %555 = vsyncpa [#allocation3], 1 }
 0x36d   :  { %556 = vsyncpa [#allocation6], 1 }
 0x36e   :  { %557 = vsyncpa [#allocation4], 1 }

</bundles_post_ra>
